<compile_context>
chip_gen: v7x
topology: tpu7x:2x2x1
jax: 0.10.0
libtpu: 0.0.40
codegen_flags: <defaults>
</compile_context>

<pallas_src>
import jax
import jax.numpy as jnp
from jax.experimental import pallas as pl
from jax.experimental.pallas import tpu as pltpu

D_IN = 1728
D_IN_PAD = 1792      # 14 * 128
H1 = 100
H2 = 25
H3 = 100
D_OUT = 3
D_OUT_PAD = 128      # lane-dense output block


def _round_up(n, m):
    return ((n + m - 1) // m) * m


def mlp_kernel(x_ref,
               w1_ref, b1_ref,
               w2_ref, b2_ref,
               w3_ref, b3_ref,
               w4_ref, b4_ref,
               o_ref):
    """Whole 4-layer MLP for one (TB, 1792) batch tile, fully resident in VMEM.

    x / weights are bf16, matmuls accumulate in f32, biases added in f32.
    """
    x = x_ref[...]                                                    # (TB, 1792) bf16

    # fc1 + ReLU   (dropout p=0.1 is identity in eval mode)
    h1 = jnp.dot(x, w1_ref[...], preferred_element_type=jnp.float32) + b1_ref[...]
    h1 = jnp.maximum(h1, 0.0).astype(jnp.bfloat16)                    # (TB, 100)

    # fc2 + ReLU
    h2 = jnp.dot(h1, w2_ref[...], preferred_element_type=jnp.float32) + b2_ref[...]
    h2 = jnp.maximum(h2, 0.0).astype(jnp.bfloat16)                    # (TB, 25)

    # fc3 + ReLU   (dropout p=0.1 is identity in eval mode)
    h3 = jnp.dot(h2, w3_ref[...], preferred_element_type=jnp.float32) + b3_ref[...]
    h3 = jnp.maximum(h3, 0.0).astype(jnp.bfloat16)                    # (TB, 100)

    # fc4 (no activation), lane-dense 128-wide padded output
    o_ref[...] = (jnp.dot(h3, w4_ref[...], preferred_element_type=jnp.float32)
                  + b4_ref[...]).astype(o_ref.dtype)                  # (TB, 128)


def net_forward(x, params, *, tb=512, vmem_limit_bytes=48 << 20):
    """x: (B, 1728) float32 -> (B, 3) float32."""
    (w1, b1), (w2, b2), (w3, b3), (w4, b4) = params
    B = x.shape[0]

    # ---- host-side prep (zero-padding preserves the math exactly) ----------
    # Batch tile: never bigger than the (8-aligned) batch itself.
    tb_eff = min(tb, _round_up(B, 8))
    b_pad = _round_up(B, tb_eff)

    xp = jnp.pad(x, ((0, b_pad - B), (0, D_IN_PAD - D_IN))).astype(jnp.bfloat16)

    w1p = jnp.pad(w1, ((0, D_IN_PAD - D_IN), (0, 0))).astype(jnp.bfloat16)   # (1792, 100)
    w2p = w2.astype(jnp.bfloat16)                                            # (100, 25)
    w3p = w3.astype(jnp.bfloat16)                                            # (25, 100)
    w4p = jnp.pad(w4, ((0, 0), (0, D_OUT_PAD - D_OUT))).astype(jnp.bfloat16) # (100, 128)
    b4p = jnp.pad(b4, ((0, 0), (0, D_OUT_PAD - D_OUT)))                      # (1, 128) f32

    grid = (b_pad // tb_eff,)

    # Weights / biases: full-array blocks, constant index_map -> VMEM-resident.
    const = lambda shape: pl.BlockSpec(shape, lambda i: tuple(0 for _ in shape))

    out_padded = pl.pallas_call(
        mlp_kernel,
        out_shape=jax.ShapeDtypeStruct((b_pad, D_OUT_PAD), jnp.float32),
        grid_spec=pltpu.PrefetchScalarGridSpec(
            num_scalar_prefetch=0,
            grid=grid,
            in_specs=[
                pl.BlockSpec((tb_eff, D_IN_PAD), lambda i: (i, 0)),   # x batch tiles
                const(w1p.shape), const(b1.shape),
                const(w2p.shape), const(b2.shape),
                const(w3p.shape), const(b3.shape),
                const(w4p.shape), const(b4p.shape),
            ],
            out_specs=pl.BlockSpec((tb_eff, D_OUT_PAD), lambda i: (i, 0)),
        ),
        compiler_params=pltpu.CompilerParams(
            dimension_semantics=("parallel",),          # megacore sharding on v7x
            vmem_limit_bytes=vmem_limit_bytes,
        ),
    )(xp, w1p, b1, w2p, b2, w3p, b3, w4p, b4p)

    return out_padded[:B, :D_OUT]


def init_params(key):
    """Deterministic synthetic parameters matching nn.Linear shapes.

    PyTorch stores weight as (out, in); we store the transpose (in, out)."""
    dims = [(D_IN, H1), (H1, H2), (H2, H3), (H3, D_OUT)]
    params = []
    for (fan_in, fan_out) in dims:
        key, kw, kb = jax.random.split(key, 3)
        bound = 1.0 / jnp.sqrt(fan_in)
        w = jax.random.uniform(kw, (fan_in, fan_out), jnp.float32, -bound, bound)
        b = jax.random.uniform(kb, (1, fan_out), jnp.float32, -bound, bound)
        params.append((w, b))
    return params


def reference_forward(x, params):
    """Pure-JAX reference mimicking the kernel's bf16-input / f32-accum math."""
    h = x.astype(jnp.bfloat16)
    for i, (w, b) in enumerate(params):
        h = jnp.dot(h, w.astype(jnp.bfloat16),
                    preferred_element_type=jnp.float32) + b
        if i < 3:
            h = jnp.maximum(h, 0.0).astype(jnp.bfloat16)
    return h


if __name__ == "__main__":
    key = jax.random.PRNGKey(0)
    key, kx = jax.random.split(key)

    B = 8
    x = jax.random.normal(kx, (B, D_IN), dtype=jnp.float32)
    params = init_params(key)

    out = net_forward(x, params)
    out = jax.block_until_ready(out)

    ref = reference_forward(x, params)
    assert out.shape == (B, D_OUT)
    assert jnp.allclose(out, ref, atol=1e-3, rtol=1e-3), "mismatch vs JAX reference"

    print("KERNEL_OK")
</pallas_src>

<mosaic_0001>
module attributes {stable_mosaic.version = 11 : i64} {
  func.func @mlp_kernel(%arg0: i32, %arg1: memref<8x1792xbf16, #tpu.memory_space<vmem>>, %arg2: memref<1792x100xbf16, #tpu.memory_space<vmem>>, %arg3: memref<1x100xf32, #tpu.memory_space<vmem>>, %arg4: memref<100x25xbf16, #tpu.memory_space<vmem>>, %arg5: memref<1x25xf32, #tpu.memory_space<vmem>>, %arg6: memref<25x100xbf16, #tpu.memory_space<vmem>>, %arg7: memref<1x100xf32, #tpu.memory_space<vmem>>, %arg8: memref<100x128xbf16, #tpu.memory_space<vmem>>, %arg9: memref<1x128xf32, #tpu.memory_space<vmem>>, %arg10: memref<8x128xf32, #tpu.memory_space<vmem>>) attributes {dimension_semantics = [#tpu.dimension_semantics<parallel>], iteration_bounds = array<i64: 1>, scalar_prefetch = 0 : i64, scratch_operands = 0 : i64, tpu.core_type = #tpu.core_type<tc>, window_params = [{transform_indices = @transform_0, window_bounds = array<i64: 8, 1792>}, {pipeline_mode = #tpu.pipeline_mode<synchronous>, transform_indices = @transform_1, window_bounds = array<i64: 1792, 100>}, {pipeline_mode = #tpu.pipeline_mode<synchronous>, transform_indices = @transform_2, window_bounds = array<i64: 1, 100>}, {pipeline_mode = #tpu.pipeline_mode<synchronous>, transform_indices = @transform_3, window_bounds = array<i64: 100, 25>}, {pipeline_mode = #tpu.pipeline_mode<synchronous>, transform_indices = @transform_4, window_bounds = array<i64: 1, 25>}, {pipeline_mode = #tpu.pipeline_mode<synchronous>, transform_indices = @transform_5, window_bounds = array<i64: 25, 100>}, {pipeline_mode = #tpu.pipeline_mode<synchronous>, transform_indices = @transform_6, window_bounds = array<i64: 1, 100>}, {pipeline_mode = #tpu.pipeline_mode<synchronous>, transform_indices = @transform_7, window_bounds = array<i64: 100, 128>}, {pipeline_mode = #tpu.pipeline_mode<synchronous>, transform_indices = @transform_8, window_bounds = array<i64: 1, 128>}, {transform_indices = @transform_9, window_bounds = array<i64: 8, 128>}]} {
    %c0 = arith.constant 0 : index
    %c0_0 = arith.constant 0 : index
    %0 = vector.load %arg1[%c0, %c0_0] : memref<8x1792xbf16, #tpu.memory_space<vmem>>, vector<8x1792xbf16>
    %c0_1 = arith.constant 0 : index
    %c0_2 = arith.constant 0 : index
    %1 = vector.load %arg2[%c0_1, %c0_2] : memref<1792x100xbf16, #tpu.memory_space<vmem>>, vector<1792x100xbf16>
    %cst = arith.constant dense<0.000000e+00> : vector<8x100xf32>
    %2 = tpu.matmul %0, %1, %cst {dimension_numbers = #tpu.dot_dimension_numbers<[1], [0], [0], [1], [0, 0, 1, 1], [], []>} : vector<8x1792xbf16>, vector<1792x100xbf16>, vector<8x100xf32> -> vector<8x100xf32>
    %c0_3 = arith.constant 0 : index
    %c0_4 = arith.constant 0 : index
    %3 = vector.load %arg3[%c0_3, %c0_4] : memref<1x100xf32, #tpu.memory_space<vmem>>, vector<1x100xf32>
    %4 = vector.broadcast %3 : vector<1x100xf32> to vector<8x100xf32>
    %5 = arith.addf %2, %4 : vector<8x100xf32>
    %cst_5 = arith.constant 0.000000e+00 : f32
    %6 = vector.broadcast %cst_5 : f32 to vector<8x100xf32>
    %7 = arith.maximumf %5, %6 : vector<8x100xf32>
    %8 = arith.truncf %7 : vector<8x100xf32> to vector<8x100xbf16>
    %c0_6 = arith.constant 0 : index
    %c0_7 = arith.constant 0 : index
    %9 = vector.load %arg4[%c0_6, %c0_7] : memref<100x25xbf16, #tpu.memory_space<vmem>>, vector<100x25xbf16>
    %cst_8 = arith.constant dense<0.000000e+00> : vector<8x25xf32>
    %10 = tpu.matmul %8, %9, %cst_8 {dimension_numbers = #tpu.dot_dimension_numbers<[1], [0], [0], [1], [0, 0, 1, 1], [], []>} : vector<8x100xbf16>, vector<100x25xbf16>, vector<8x25xf32> -> vector<8x25xf32>
    %c0_9 = arith.constant 0 : index
    %c0_10 = arith.constant 0 : index
    %11 = vector.load %arg5[%c0_9, %c0_10] : memref<1x25xf32, #tpu.memory_space<vmem>>, vector<1x25xf32>
    %12 = vector.broadcast %11 : vector<1x25xf32> to vector<8x25xf32>
    %13 = arith.addf %10, %12 : vector<8x25xf32>
    %cst_11 = arith.constant 0.000000e+00 : f32
    %14 = vector.broadcast %cst_11 : f32 to vector<8x25xf32>
    %15 = arith.maximumf %13, %14 : vector<8x25xf32>
    %16 = arith.truncf %15 : vector<8x25xf32> to vector<8x25xbf16>
    %c0_12 = arith.constant 0 : index
    %c0_13 = arith.constant 0 : index
    %17 = vector.load %arg6[%c0_12, %c0_13] : memref<25x100xbf16, #tpu.memory_space<vmem>>, vector<25x100xbf16>
    %cst_14 = arith.constant dense<0.000000e+00> : vector<8x100xf32>
    %18 = tpu.matmul %16, %17, %cst_14 {dimension_numbers = #tpu.dot_dimension_numbers<[1], [0], [0], [1], [0, 0, 1, 1], [], []>} : vector<8x25xbf16>, vector<25x100xbf16>, vector<8x100xf32> -> vector<8x100xf32>
    %c0_15 = arith.constant 0 : index
    %c0_16 = arith.constant 0 : index
    %19 = vector.load %arg7[%c0_15, %c0_16] : memref<1x100xf32, #tpu.memory_space<vmem>>, vector<1x100xf32>
    %20 = vector.broadcast %19 : vector<1x100xf32> to vector<8x100xf32>
    %21 = arith.addf %18, %20 : vector<8x100xf32>
    %cst_17 = arith.constant 0.000000e+00 : f32
    %22 = vector.broadcast %cst_17 : f32 to vector<8x100xf32>
    %23 = arith.maximumf %21, %22 : vector<8x100xf32>
    %24 = arith.truncf %23 : vector<8x100xf32> to vector<8x100xbf16>
    %c0_18 = arith.constant 0 : index
    %c0_19 = arith.constant 0 : index
    %25 = vector.load %arg8[%c0_18, %c0_19] : memref<100x128xbf16, #tpu.memory_space<vmem>>, vector<100x128xbf16>
    %cst_20 = arith.constant dense<0.000000e+00> : vector<8x128xf32>
    %26 = tpu.matmul %24, %25, %cst_20 {dimension_numbers = #tpu.dot_dimension_numbers<[1], [0], [0], [1], [0, 0, 1, 1], [], []>} : vector<8x100xbf16>, vector<100x128xbf16>, vector<8x128xf32> -> vector<8x128xf32>
    %c0_21 = arith.constant 0 : index
    %c0_22 = arith.constant 0 : index
    %27 = vector.load %arg9[%c0_21, %c0_22] : memref<1x128xf32, #tpu.memory_space<vmem>>, vector<1x128xf32>
    %28 = vector.broadcast %27 : vector<1x128xf32> to vector<8x128xf32>
    %29 = arith.addf %26, %28 : vector<8x128xf32>
    %c0_23 = arith.constant 0 : index
    %c0_24 = arith.constant 0 : index
    %30 = vector.load %arg10[%c0_23, %c0_24] : memref<8x128xf32, #tpu.memory_space<vmem>>, vector<8x128xf32>
    tpu.vector_store %arg10[%c0_23, %c0_24], %29 {strides = array<i32>} : memref<8x128xf32, #tpu.memory_space<vmem>>, vector<8x128xf32>,
    return
  }
  func.func @transform_0(%arg0: i32) -> (i32, i32) {
    %c0_i32 = arith.constant 0 : i32
    %c0_i32_0 = arith.constant 0 : i32
    return %arg0, %c0_i32 : i32, i32
  }
  func.func @transform_1(%arg0: i32) -> (i32, i32) {
    %c0_i32 = arith.constant 0 : i32
    %c0_i32_0 = arith.constant 0 : i32
    %c0_i32_1 = arith.constant 0 : i32
    return %c0_i32, %c0_i32_0 : i32, i32
  }
  func.func @transform_2(%arg0: i32) -> (i32, i32) {
    %c0_i32 = arith.constant 0 : i32
    %c0_i32_0 = arith.constant 0 : i32
    %c0_i32_1 = arith.constant 0 : i32
    return %c0_i32, %c0_i32_0 : i32, i32
  }
  func.func @transform_3(%arg0: i32) -> (i32, i32) {
    %c0_i32 = arith.constant 0 : i32
    %c0_i32_0 = arith.constant 0 : i32
    %c0_i32_1 = arith.constant 0 : i32
    return %c0_i32, %c0_i32_0 : i32, i32
  }
  func.func @transform_4(%arg0: i32) -> (i32, i32) {
    %c0_i32 = arith.constant 0 : i32
    %c0_i32_0 = arith.constant 0 : i32
    %c0_i32_1 = arith.constant 0 : i32
    return %c0_i32, %c0_i32_0 : i32, i32
  }
  func.func @transform_5(%arg0: i32) -> (i32, i32) {
    %c0_i32 = arith.constant 0 : i32
    %c0_i32_0 = arith.constant 0 : i32
    %c0_i32_1 = arith.constant 0 : i32
    return %c0_i32, %c0_i32_0 : i32, i32
  }
  func.func @transform_6(%arg0: i32) -> (i32, i32) {
    %c0_i32 = arith.constant 0 : i32
    %c0_i32_0 = arith.constant 0 : i32
    %c0_i32_1 = arith.constant 0 : i32
    return %c0_i32, %c0_i32_0 : i32, i32
  }
  func.func @transform_7(%arg0: i32) -> (i32, i32) {
    %c0_i32 = arith.constant 0 : i32
    %c0_i32_0 = arith.constant 0 : i32
    %c0_i32_1 = arith.constant 0 : i32
    return %c0_i32, %c0_i32_0 : i32, i32
  }
  func.func @transform_8(%arg0: i32) -> (i32, i32) {
    %c0_i32 = arith.constant 0 : i32
    %c0_i32_0 = arith.constant 0 : i32
    %c0_i32_1 = arith.constant 0 : i32
    return %c0_i32, %c0_i32_0 : i32, i32
  }
  func.func @transform_9(%arg0: i32) -> (i32, i32) {
    %c0_i32 = arith.constant 0 : i32
    %c0_i32_0 = arith.constant 0 : i32
    return %arg0, %c0_i32 : i32, i32
  }
}

</mosaic_0001>

<bundles_post_ra>
// kernel: tpu_custom_call.1
= control target key start
LH: loop header
LB: loop body
LE: loop exit
PB: predicated region body
PF: predicated region fallthrough
CT: control target
= control target key end

     0   :  { %s2624_s0 = inlined_call_operand.vmem [shape: bf16[8,1792], index: 0, kind: input, shape index: {}]   ;;  %s2625_s1 = inlined_call_operand.vmem [shape: bf16[1792,100], index: 1, kind: input, shape index: {}]   ;;  %s2626_s2 = inlined_call_operand.vmem [shape: f32[1,100], index: 2, kind: input, shape index: {}]   ;;  %s2627_s3 = inlined_call_operand.vmem [shape: bf16[100,25], index: 3, kind: input, shape index: {}]   ;;  %s2628_s4 = inlined_call_operand.vmem [shape: f32[1,25], index: 4, kind: input, shape index: {}]   ;;  %s2629_s5 = inlined_call_operand.vmem [shape: bf16[25,100], index: 5, kind: input, shape index: {}]   ;;  %s2630_s6 = inlined_call_operand.vmem [shape: f32[1,100], index: 6, kind: input, shape index: {}]   ;;  %s2631_s7 = inlined_call_operand.vmem [shape: bf16[100,128], index: 7, kind: input, shape index: {}]   ;;  %s2632_s8 = inlined_call_operand.vmem [shape: f32[1,128], index: 8, kind: input, shape index: {}]   ;;  %s2633_s9 = inlined_call_operand.hbm [shape: f32[8,128], index: 9, kind: output, shape index: {}]  }
   0x1   :  { %v1949_v0 = vld [vmem:[%s2625_s1 + $0x40] sm:$0xff]   ;;  %v1953_v4 = vld [vmem:[%s2625_s1 + $0x48] sm:$0xff]   ;;  %v1957_v8 = vld [vmem:[%s2625_s1 + $0x50] sm:$0xff]  }
   0x2   :  { %v1950_v1 = vld [vmem:[%s2625_s1] sm:$0xff]   ;;  %1728 = vmatprep.subr.bf16.mxu0 %v1949_v0  ;;  %v1954_v5 = vld [vmem:[%s2625_s1 + $0x8] sm:$0xff]   ;;  %v1958_v9 = vld [vmem:[%s2625_s1 + $0x10] sm:$0xff]  }
   0x3   :  { %v1951_v2 = vld [vmem:[%s2625_s1 + $0xc0] sm:$0xff]   ;;  %1729 = vmatpush3.bf16.msra.mxu0 %v1950_v1  ;;  %v1955_v6 = vld [vmem:[%s2625_s1 + $0xc8] sm:$0xff]   ;;  %v1959_v10 = vld [vmem:[%s2625_s1 + $0xd0] sm:$0xff]  }
   0x4   :  { %v1952_v3 = vld [vmem:[%s2625_s1 + $0x80] sm:$0xff]   ;;  %1750 = vmatprep.subr.bf16.mxu1 %v1951_v2  ;;  %1730 = vmatprep.subr.bf16.mxu0 %v1953_v4  ;;  %v1956_v7 = vld [vmem:[%s2625_s1 + $0x88] sm:$0xff]   ;;  %v1960_v11 = vld [vmem:[%s2625_s1 + $0x90] sm:$0xff]  }
   0x5   :  { %1751 = vmatpush3.bf16.msra.mxu1 %v1952_v3  ;;  %v1961_v12 = vld [vmem:[%s2625_s1 + $0x58] sm:$0xff]   ;;  %v1965_v16 = vld [vmem:[%s2625_s1 + $0x60] sm:$0xff]   ;;  %v1969_v20 = vld [vmem:[%s2625_s1 + $0x68] sm:$0xff]  }
   0x6   :  { %1752 = vmatprep.subr.bf16.mxu1 %v1955_v6  ;;  %v1962_v13 = vld [vmem:[%s2625_s1 + $0x18] sm:$0xff]   ;;  %v1966_v17 = vld [vmem:[%s2625_s1 + $0x20] sm:$0xff]   ;;  %v1970_v21 = vld [vmem:[%s2625_s1 + $0x28] sm:$0xff]  }
   0x7   :  { %1731 = vmatpush3.bf16.msra.mxu0 %v1954_v5  ;;  %v1963_v14 = vld [vmem:[%s2625_s1 + $0xd8] sm:$0xff]   ;;  %v1967_v18 = vld [vmem:[%s2625_s1 + $0xe0] sm:$0xff]   ;;  %v1971_v22 = vld [vmem:[%s2625_s1 + $0xe8] sm:$0xff]  }
   0x8   :  { %1732 = vmatprep.subr.bf16.mxu0 %v1957_v8  ;;  %v1964_v15 = vld [vmem:[%s2625_s1 + $0x98] sm:$0xff]   ;;  %v1968_v19 = vld [vmem:[%s2625_s1 + $0xa0] sm:$0xff]   ;;  %v1972_v23 = vld [vmem:[%s2625_s1 + $0xa8] sm:$0xff]  }
   0x9   :  { %1753 = vmatpush3.bf16.msra.mxu1 %v1956_v7  ;;  %v1973_v24 = vld [vmem:[%s2625_s1 + $0x70] sm:$0xff]   ;;  %v1977_v28 = vld [vmem:[%s2625_s1 + $0x78] sm:$0xff]   ;;  %v34_v31 = vld [vmem:[%s2624_s0] sm:$0xff] }
   0xa   :  { %1754 = vmatprep.subr.bf16.mxu1 %v1959_v10  ;;  %v1974_v25 = vld [vmem:[%s2625_s1 + $0x30] sm:$0xff]   ;;  %v1978_v29 = vld [vmem:[%s2625_s1 + $0x38] sm:$0xff]   ;;  %v1580_v32 = vcombine.low %v34_v31, %v34_v31  ;;  %v1581_v33 = vcombine.high %v34_v31, %v34_v31  ;;  %v1983_v35 = vld [vmem:[%s2625_s1 + $0x140] sm:$0xff]  }
   0xb   :  { %1733 = vmatpush3.bf16.msra.mxu0 %v1958_v9  ;;  %v1975_v26 = vld [vmem:[%s2625_s1 + $0xf0] sm:$0xff]   ;;  %v1979_v30 = vld [vmem:[%s2625_s1 + $0xf8] sm:$0xff]   ;;  %v35_v36 = vld [vmem:[%s2624_s0 + $0x8] sm:$0xff] }
   0xc   :  { %1734 = vmatprep.subr.bf16.mxu0 %v1961_v12  ;;  %v1976_v27 = vld [vmem:[%s2625_s1 + $0xb0] sm:$0xff]   ;;  %v1982_v34 = vld [vmem:[%s2625_s1 + $0xb8] sm:$0xff]   ;;  %1025 = vmatprep.mubr.bf16.mxu0 %v1581_v33  ;;  %v1582_v37 = vcombine.low %v35_v36, %v35_v36  ;;  %v1583_v38 = vcombine.high %v35_v36, %v35_v36  ;;  %v1986_v39 = vld [vmem:[%s2625_s1 + $0x100] sm:$0xff]  }
   0xd   :  { %1755 = vmatpush3.bf16.msra.mxu1 %v1960_v11  ;;  %v1987_v40 = vld [vmem:[%s2625_s1 + $0x1c0] sm:$0xff]   ;;  %v1989_v42 = vld [vmem:[%s2625_s1 + $0x148] sm:$0xff]   ;;  %v1993_v46 = vld [vmem:[%s2625_s1 + $0x150] sm:$0xff]  }
   0xe   :  { %1756 = vmatprep.subr.bf16.mxu1 %v1963_v14  ;;  %1065 = vmatprep.mubr.bf16.mxu1 %v1583_v38  ;;  %v1988_v41 = vld [vmem:[%s2625_s1 + $0x180] sm:$0xff]   ;;  %v1990_v43 = vld [vmem:[%s2625_s1 + $0x108] sm:$0xff]   ;;  %v1994_v47 = vld [vmem:[%s2625_s1 + $0x110] sm:$0xff]  }
   0xf   :  { %1735 = vmatpush3.bf16.msra.mxu0 %v1962_v13  ;;  %v1991_v44 = vld [vmem:[%s2625_s1 + $0x1c8] sm:$0xff]   ;;  %v1995_v48 = vld [vmem:[%s2625_s1 + $0x1d0] sm:$0xff]   ;;  %v1997_v50 = vld [vmem:[%s2625_s1 + $0x158] sm:$0xff]  }
  0x10   :  { %1736 = vmatprep.subr.bf16.mxu0 %v1965_v16  ;;  %v1992_v45 = vld [vmem:[%s2625_s1 + $0x188] sm:$0xff]   ;;  %v1996_v49 = vld [vmem:[%s2625_s1 + $0x190] sm:$0xff]   ;;  %v1998_v51 = vld [vmem:[%s2625_s1 + $0x118] sm:$0xff]  }
  0x11   :  { %1757 = vmatpush3.bf16.msra.mxu1 %v1964_v15  ;;  %v1999_v52 = vld [vmem:[%s2625_s1 + $0x1d8] sm:$0xff]   ;;  %v2001_v54 = vld [vmem:[%s2625_s1 + $0x160] sm:$0xff]   ;;  %v2005_v58 = vld [vmem:[%s2625_s1 + $0x168] sm:$0xff]  }
  0x12   :  { %1758 = vmatprep.subr.bf16.mxu1 %v1967_v18  ;;  %v2000_v53 = vld [vmem:[%s2625_s1 + $0x198] sm:$0xff]   ;;  %v2002_v55 = vld [vmem:[%s2625_s1 + $0x120] sm:$0xff]   ;;  %v2006_v59 = vld [vmem:[%s2625_s1 + $0x128] sm:$0xff]  }
  0x13   :  { %1737 = vmatpush3.bf16.msra.mxu0 %v1966_v17  ;;  %v2003_v56 = vld [vmem:[%s2625_s1 + $0x1e0] sm:$0xff]   ;;  %v2007_v60 = vld [vmem:[%s2625_s1 + $0x1e8] sm:$0xff]   ;;  %v2009_v62 = vld [vmem:[%s2625_s1 + $0x170] sm:$0xff]  }
  0x14   :  { %1738 = vmatprep.subr.bf16.mxu0 %v1969_v20  ;;  %v2004_v57 = vld [vmem:[%s2625_s1 + $0x1a0] sm:$0xff]   ;;  %v2008_v61 = vld [vmem:[%s2625_s1 + $0x1a8] sm:$0xff]   ;;  %v2010_v63 = vld [vmem:[%s2625_s1 + $0x130] sm:$0xff]  }
  0x15   :  { %1759 = vmatpush3.bf16.msra.mxu1 %v1968_v19  ;;  %v2011_v0 = vld [vmem:[%s2625_s1 + $0x1f0] sm:$0xff]   ;;  %v2013_v2 = vld [vmem:[%s2625_s1 + $0x178] sm:$0xff]   ;;  %v2019_v9 = vld [vmem:[%s2625_s1 + $0x240] sm:$0xff]  }
  0x16   :  { %1760 = vmatprep.subr.bf16.mxu1 %v1971_v22  ;;  %v2012_v1 = vld [vmem:[%s2625_s1 + $0x1b0] sm:$0xff]   ;;  %v2014_v3 = vld [vmem:[%s2625_s1 + $0x138] sm:$0xff]   ;;  %v2022_v13 = vld [vmem:[%s2625_s1 + $0x200] sm:$0xff]  }
  0x17   :  { %1739 = vmatpush3.bf16.msra.mxu0 %v1970_v21  ;;  %v2015_v4 = vld [vmem:[%s2625_s1 + $0x1f8] sm:$0xff]   ;;  %v36_v5 = vld [vmem:[%s2624_s0 + $0x10] sm:$0xff]  ;;  %v2023_v14 = vld [vmem:[%s2625_s1 + $0x2c0] sm:$0xff]  }
  0x18   :  { %1740 = vmatprep.subr.bf16.mxu0 %v1973_v24  ;;  %v1584_v6 = vcombine.low %v36_v5, %v36_v5  ;;  %v1585_v7 = vcombine.high %v36_v5, %v36_v5  ;;  %v2018_v8 = vld [vmem:[%s2625_s1 + $0x1b8] sm:$0xff]   ;;  %v2024_v15 = vld [vmem:[%s2625_s1 + $0x280] sm:$0xff]   ;;  %v2025_v16 = vld [vmem:[%s2625_s1 + $0x248] sm:$0xff]  }
  0x19   :  { %1761 = vmatpush3.bf16.msra.mxu1 %v1972_v23  ;;  %v37_v10 = vld [vmem:[%s2624_s0 + $0x18] sm:$0xff]  ;;  %v2026_v17 = vld [vmem:[%s2625_s1 + $0x208] sm:$0xff]   ;;  %v2029_v20 = vld [vmem:[%s2625_s1 + $0x250] sm:$0xff]  }
  0x1a   :  { %1762 = vmatprep.subr.bf16.mxu1 %v1975_v26  ;;  %v1586_v11 = vcombine.low %v37_v10, %v37_v10  ;;  %v1587_v12 = vcombine.high %v37_v10, %v37_v10  ;;  %v2027_v18 = vld [vmem:[%s2625_s1 + $0x2c8] sm:$0xff]   ;;  %v2030_v21 = vld [vmem:[%s2625_s1 + $0x210] sm:$0xff]   ;;  %v2033_v24 = vld [vmem:[%s2625_s1 + $0x258] sm:$0xff]  }
  0x1b   :  { %1741 = vmatpush3.bf16.msra.mxu0 %v1974_v25  ;;  %v2028_v19 = vld [vmem:[%s2625_s1 + $0x288] sm:$0xff]   ;;  %v2031_v22 = vld [vmem:[%s2625_s1 + $0x2d0] sm:$0xff]   ;;  %v2034_v25 = vld [vmem:[%s2625_s1 + $0x218] sm:$0xff]  }
  0x1c   :  { %1742 = vmatprep.subr.bf16.mxu0 %v1977_v28  ;;  %v2032_v23 = vld [vmem:[%s2625_s1 + $0x290] sm:$0xff]   ;;  %v2035_v26 = vld [vmem:[%s2625_s1 + $0x2d8] sm:$0xff]   ;;  %v2037_v28 = vld [vmem:[%s2625_s1 + $0x260] sm:$0xff]  }
  0x1d   :  { %1763 = vmatpush3.bf16.msra.mxu1 %v1976_v27  ;;  %v2036_v27 = vld [vmem:[%s2625_s1 + $0x298] sm:$0xff]   ;;  %v2040_v31 = vld [vmem:[%s2625_s1 + $0x2a0] sm:$0xff]   ;;  %v2042_v33 = vld [vmem:[%s2625_s1 + $0x228] sm:$0xff]  }
  0x1e   :  { %1764 = vmatprep.subr.bf16.mxu1 %v1979_v30  ;;  %v2039_v30 = vld [vmem:[%s2625_s1 + $0x2e0] sm:$0xff]   ;;  %v2045_v36 = vld [vmem:[%s2625_s1 + $0x270] sm:$0xff]  }
  0x1f   :  { %1743 = vmatpush3.bf16.msra.mxu0 %v1978_v29  ;;  %v2038_v29 = vld [vmem:[%s2625_s1 + $0x220] sm:$0xff]   ;;  %v2047_v38 = vld [vmem:[%s2625_s1 + $0x2f0] sm:$0xff]  }
  0x20   :  { %1772 = vmatprep.subr.bf16.mxu0 %v1983_v35  ;;  %v2044_v35 = vld [vmem:[%s2625_s1 + $0x2a8] sm:$0xff]  }
  0x21   :  { %1765 = vmatpush3.bf16.msra.mxu1 %v1982_v34  ;;  %v2043_v34 = vld [vmem:[%s2625_s1 + $0x2e8] sm:$0xff]  }
  0x22   :  { %1026 = vmatmul.mubr.bf16.vlgmr.msra.gmra.mrb[0].mxu0 %v1580_v32  ;;  %1794 = vmatprep.subr.bf16.mxu1 %v1987_v40  ;;  %v2041_v32 = vld [vmem:[%s2625_s1 + $0x268] sm:$0xff]   ;;  %v2049_v40 = vld [vmem:[%s2625_s1 + $0x278] sm:$0xff]  }
  0x23   :  { %1773 = vmatpush3.bf16.msra.mxu0 %v1986_v39  ;;  %1105 = vmatprep.mubr.bf16.mxu0 %v1585_v7  ;;  %v2048_v39 = vld [vmem:[%s2625_s1 + $0x2b0] sm:$0xff]  }
  0x24   :  { %1066 = vmatmul.mubr.bf16.vlgmr.msra.gmra.mrb[0].mxu1 %v1582_v37  ;;  %1774 = vmatprep.subr.bf16.mxu0 %v1989_v42  ;;  %v2046_v37 = vld [vmem:[%s2625_s1 + $0x230] sm:$0xff]   ;;  %v2051_v42 = vld [vmem:[%s2625_s1 + $0x2f8] sm:$0xff]  }
  0x25   :  { %1795 = vmatpush3.bf16.msra.mxu1 %v1988_v41  ;;  %1145 = vmatprep.mubr.bf16.mxu1 %v1587_v12  ;;  %v2050_v41 = vld [vmem:[%s2625_s1 + $0x238] sm:$0xff]  }
  0x26   :  { %1796 = vmatprep.subr.bf16.mxu1 %v1991_v44 }
  0x27   :  { %1775 = vmatpush3.bf16.msra.mxu0 %v1990_v43  ;;  %v38_v43 = vld [vmem:[%s2624_s0 + $0x20] sm:$0xff] }
  0x28   :  { %1776 = vmatprep.subr.bf16.mxu0 %v1993_v46  ;;  %v1588_v44 = vcombine.low %v38_v43, %v38_v43  ;;  %v2054_v46 = vld [vmem:[%s2625_s1 + $0x2b8] sm:$0xff]  }
  0x29   :  { %1797 = vmatpush3.bf16.msra.mxu1 %v1992_v45  ;;  %v1589_v45 = vcombine.high %v38_v43, %v38_v43 }
  0x2a   :  { %1798 = vmatprep.subr.bf16.mxu1 %v1995_v48  ;;  %v39_v48 = vld [vmem:[%s2624_s0 + $0x28] sm:$0xff] }
  0x2b   :  { %1777 = vmatpush3.bf16.msra.mxu0 %v1994_v47  ;;  %v2055_v47 = vld [vmem:[%s2625_s1 + $0x340] sm:$0xff]  }
  0x2c   :  { %1778 = vmatprep.subr.bf16.mxu0 %v1997_v50  ;;  %v1591_v50 = vcombine.high %v39_v48, %v39_v48 }
  0x2d   :  { %1799 = vmatpush3.bf16.msra.mxu1 %v1996_v49  ;;  %v1590_v49 = vcombine.low %v39_v48, %v39_v48 }
  0x2e   :  { %1800 = vmatprep.subr.bf16.mxu1 %v1999_v52  ;;  %v2059_v52 = vld [vmem:[%s2625_s1 + $0x348] sm:$0xff]  }
  0x2f   :  { %1779 = vmatpush3.bf16.msra.mxu0 %v1998_v51  ;;  %v2058_v51 = vld [vmem:[%s2625_s1 + $0x300] sm:$0xff]  }
  0x30   :  { %1780 = vmatprep.subr.bf16.mxu0 %v2001_v54  ;;  %v2061_v54 = vld [vmem:[%s2625_s1 + $0x350] sm:$0xff]  }
  0x31   :  { %1801 = vmatpush3.bf16.msra.mxu1 %v2000_v53  ;;  %v2060_v53 = vld [vmem:[%s2625_s1 + $0x308] sm:$0xff]  }
  0x32   :  { %1802 = vmatprep.subr.bf16.mxu1 %v2003_v56  ;;  %v2063_v56 = vld [vmem:[%s2625_s1 + $0x358] sm:$0xff]  }
  0x33   :  { %1781 = vmatpush3.bf16.msra.mxu0 %v2002_v55  ;;  %v2062_v55 = vld [vmem:[%s2625_s1 + $0x310] sm:$0xff]  }
  0x34   :  { %1782 = vmatprep.subr.bf16.mxu0 %v2005_v58  ;;  %v2065_v58 = vld [vmem:[%s2625_s1 + $0x360] sm:$0xff]  }
  0x35   :  { %1803 = vmatpush3.bf16.msra.mxu1 %v2004_v57  ;;  %v2064_v57 = vld [vmem:[%s2625_s1 + $0x318] sm:$0xff]  }
  0x36   :  { %1804 = vmatprep.subr.bf16.mxu1 %v2007_v60  ;;  %v2067_v60 = vld [vmem:[%s2625_s1 + $0x368] sm:$0xff]  }
  0x37   :  { %1783 = vmatpush3.bf16.msra.mxu0 %v2006_v59  ;;  %v2066_v59 = vld [vmem:[%s2625_s1 + $0x320] sm:$0xff]  }
  0x38   :  { %1784 = vmatprep.subr.bf16.mxu0 %v2009_v62  ;;  %v2068_v62 = vld [vmem:[%s2625_s1 + $0x328] sm:$0xff]  }
  0x39   :  { %1805 = vmatpush3.bf16.msra.mxu1 %v2008_v61  ;;  %v40_v61 = vld [vmem:[%s2624_s0 + $0x30] sm:$0xff] }
  0x3a   :  { %1806 = vmatprep.subr.bf16.mxu1 %v2011_v0  ;;  %v2069_v0 = vld [vmem:[%s2625_s1 + $0x370] sm:$0xff]  }
  0x3b   :  { %1785 = vmatpush3.bf16.msra.mxu0 %v2010_v63  ;;  %v1593_v63 = vcombine.high %v40_v61, %v40_v61 }
  0x3c   :  { %1786 = vmatprep.subr.bf16.mxu0 %v2013_v2  ;;  %v2071_v2 = vld [vmem:[%s2625_s1 + $0x378] sm:$0xff]  }
  0x3d   :  { %1807 = vmatpush3.bf16.msra.mxu1 %v2012_v1  ;;  %v2070_v1 = vld [vmem:[%s2625_s1 + $0x330] sm:$0xff]  }
  0x3e   :  { %1808 = vmatprep.subr.bf16.mxu1 %v2015_v4 }
  0x3f   :  { %1787 = vmatpush3.bf16.msra.mxu0 %v2014_v3 }
  0x40   :  { %1816 = vmatprep.subr.bf16.mxu0 %v2019_v9 }
  0x41   :  { %1809 = vmatpush3.bf16.msra.mxu1 %v2018_v8 }
  0x42   :  { %1106 = vmatmul.mubr.bf16.vlgmr.msra.gmra.mrb[4].mxu0 %v1584_v6  ;;  %1838 = vmatprep.subr.bf16.mxu1 %v2023_v14 }
  0x43   :  { %1817 = vmatpush3.bf16.msra.mxu0 %v2022_v13  ;;  %1185 = vmatprep.mubr.bf16.mxu0 %v1589_v45 }
  0x44   :  { %1146 = vmatmul.mubr.bf16.vlgmr.msra.gmra.mrb[4].mxu1 %v1586_v11  ;;  %1818 = vmatprep.subr.bf16.mxu0 %v2025_v16 }
  0x45   :  { %1839 = vmatpush3.bf16.msra.mxu1 %v2024_v15  ;;  %1225 = vmatprep.mubr.bf16.mxu1 %v1591_v50 }
  0x46   :  { %1840 = vmatprep.subr.bf16.mxu1 %v2027_v18 }
  0x47   :  { %1819 = vmatpush3.bf16.msra.mxu0 %v2026_v17 }
  0x48   :  { %1820 = vmatprep.subr.bf16.mxu0 %v2029_v20 }
  0x49   :  { %1841 = vmatpush3.bf16.msra.mxu1 %v2028_v19 }
  0x4a   :  { %1842 = vmatprep.subr.bf16.mxu1 %v2031_v22 }
  0x4b   :  { %1821 = vmatpush3.bf16.msra.mxu0 %v2030_v21 }
  0x4c   :  { %1822 = vmatprep.subr.bf16.mxu0 %v2033_v24 }
  0x4d   :  { %1843 = vmatpush3.bf16.msra.mxu1 %v2032_v23 }
  0x4e   :  { %1844 = vmatprep.subr.bf16.mxu1 %v2035_v26 }
  0x4f   :  { %1823 = vmatpush3.bf16.msra.mxu0 %v2034_v25 }
  0x50   :  { %1824 = vmatprep.subr.bf16.mxu0 %v2037_v28 }
  0x51   :  { %1845 = vmatpush3.bf16.msra.mxu1 %v2036_v27 }
  0x52   :  { %1846 = vmatprep.subr.bf16.mxu1 %v2039_v30 }
  0x53   :  { %1825 = vmatpush3.bf16.msra.mxu0 %v2038_v29 }
  0x54   :  { %1826 = vmatprep.subr.bf16.mxu0 %v2041_v32 }
  0x55   :  { %1847 = vmatpush3.bf16.msra.mxu1 %v2040_v31 }
  0x56   :  { %1848 = vmatprep.subr.bf16.mxu1 %v2043_v34 }
  0x57   :  { %1827 = vmatpush3.bf16.msra.mxu0 %v2042_v33 }
  0x58   :  { %1828 = vmatprep.subr.bf16.mxu0 %v2045_v36 }
  0x59   :  { %1849 = vmatpush3.bf16.msra.mxu1 %v2044_v35 }
  0x5a   :  { %1850 = vmatprep.subr.bf16.mxu1 %v2047_v38 }
  0x5b   :  { %1829 = vmatpush3.bf16.msra.mxu0 %v2046_v37 }
  0x5c   :  { %1830 = vmatprep.subr.bf16.mxu0 %v2049_v40 }
  0x5d   :  { %1851 = vmatpush3.bf16.msra.mxu1 %v2048_v39 }
  0x5e   :  { %1852 = vmatprep.subr.bf16.mxu1 %v2051_v42 }
  0x5f   :  { %1831 = vmatpush3.bf16.msra.mxu0 %v2050_v41 }
  0x60   :  { %1860 = vmatprep.subr.bf16.mxu0 %v2055_v47 }
  0x61   :  { %1853 = vmatpush3.bf16.msra.mxu1 %v2054_v46 }
  0x62   :  { %1186 = vmatmul.mubr.bf16.vlgmr.msra.gmra.mrb[8].mxu0 %v1588_v44 }
  0x63   :  { %1861 = vmatpush3.bf16.msra.mxu0 %v2058_v51  ;;  %1265 = vmatprep.mubr.bf16.mxu0 %v1593_v63 }
  0x64   :  { %1226 = vmatmul.mubr.bf16.vlgmr.msra.gmra.mrb[8].mxu1 %v1590_v49  ;;  %1862 = vmatprep.subr.bf16.mxu0 %v2059_v52 }
  0x67   :  { %1863 = vmatpush3.bf16.msra.mxu0 %v2060_v53 }
  0x68   :  { %1864 = vmatprep.subr.bf16.mxu0 %v2061_v54 }
  0x6b   :  { %1865 = vmatpush3.bf16.msra.mxu0 %v2062_v55 }
  0x6c   :  { %1866 = vmatprep.subr.bf16.mxu0 %v2063_v56 }
  0x6f   :  { %1867 = vmatpush3.bf16.msra.mxu0 %v2064_v57 }
  0x70   :  { %1868 = vmatprep.subr.bf16.mxu0 %v2065_v58 }
  0x73   :  { %1869 = vmatpush3.bf16.msra.mxu0 %v2066_v59 }
  0x74   :  { %1870 = vmatprep.subr.bf16.mxu0 %v2067_v60 }
  0x77   :  { %1871 = vmatpush3.bf16.msra.mxu0 %v2068_v62 }
  0x78   :  { %1872 = vmatprep.subr.bf16.mxu0 %v2069_v0 }
  0x79   :  { %14 = vsyncpa [#allocation3], 0  ;;  %v2072_v3 = vld [vmem:[%s2625_s1 + $0x338] sm:$0xff]   ;;  %v1592_v4 = vcombine.low %v40_v61, %v40_v61  ;;  %v2075_v5 = vld [vmem:[%s2627_s3] sm:$0xff]   ;;  %v2115_v6 = vmov 0.0   ;;  %vm1338_vm0 = vcmask 1041408  }
  0x7a   :  { %1901 = vmatprep.subr.bf16.mxu1 %v2115_v6  ;;  %v2076_v7 = vld [vmem:[%s2627_s3 + $0x8] sm:$0xff]   ;;  %v2077_v8 = vld [vmem:[%s2627_s3 + $0x10] sm:$0xff]   ;;  %v2078_v9 = vld [vmem:[%s2627_s3 + $0x18] sm:$0xff]   ;;  %vm2116_vm1 = vmmov 0   ;;  %vm1334_vm2 = vcmask 818176   ;;  %vm1410_vm3 = vcmask 1043456  }
  0x7b   :  { %1873 = vmatpush3.bf16.msra.mxu0 %v2070_v1  ;;  %1902 = vmatpush3.bf16.msra.mxu1 %v2075_v5  ;;  %v2079_v10 = vld [vmem:[%s2627_s3 + $0x20] sm:$0xff]   ;;  %v2080_v11 = vld [vmem:[%s2627_s3 + $0x28] sm:$0xff]   ;;  %v2081_v12 = vld [vmem:[%s2627_s3 + $0x30] ss:$0 sps:$4 sm:$0x33]   ;;  %vm1411_vm4 = vcmask 1044480  }
  0x7c   :  { %1874 = vmatprep.subr.bf16.mxu0 %v2071_v2  ;;  %1903 = vmatprep.subr.bf16.mxu1 %v2115_v6  ;;  %v1340_v13 = vsel %vm1338_vm0, %v2081_v12, 0  ;;  %v1579_v15 = vld [vmem:[%s2626_s2] ss:$0 sm:$0xff]  ;;  %v2083_v60 = vld [vmem:[%s2629_s5 + $0x8] sm:$0x1f]   ;;  %v2117_v61 = vmov 65535  }
  0x7d   :  { %1915 = vmatprep.mubr.msk.bf16.mxu1 %vm2116_vm1, %v2115_v6  ;;  %v2082_v58 = vld [vmem:[%s2629_s5] sm:$0xff]   ;;  %v1412_v62 = vsel %vm1410_vm3, 4294967295, %v2117_v61  ;;  %v2085_v2 = vld [vmem:[%s2631_s7 + $0x8] sm:$0xff]   ;;  %vm1406_vm5 = vcmask 203776  }
  0x7e   :  { %v1413_v63 = vsel %vm1411_vm4, %v1412_v62, 0  ;;  %v2084_v1 = vld [vmem:[%s2631_s7] sm:$0xff]  }
  0x7f   :  { %1875 = vmatpush3.bf16.msra.mxu0 %v2072_v3  ;;  %1904 = vmatpush3.bf16.msra.mxu1 %v2076_v7  ;;  %v1415_v0 = vand.u32 %v2083_v60, %v1413_v63  ;;  %v2086_v3 = vld [vmem:[%s2631_s7 + $0x10] sm:$0xff]   ;;  %v2088_v5 = vld [vmem:[%s2631_s7 + $0x20] sm:$0xff]  }
  0x80   :  { %1927 = vmatprep.subr.bf16.mxu0 %v2115_v6  ;;  %1905 = vmatprep.subr.bf16.mxu1 %v2115_v6  ;;  %v1706_v7 = vld [vmem:[%s2628_s4] ss:$0 sm:$0xff] }
  0x82   :  { %1266 = vmatmul.mubr.bf16.vlgmr.msra.gmra.mrb[12].mxu0 %v1592_v4  ;;  %v2087_v4 = vld [vmem:[%s2631_s7 + $0x18] sm:$0xff]  }
  0x83   :  { %1906 = vmatpush3.bf16.msra.mxu1 %v2077_v8  ;;  %1941 = vmatprep.mubr.msk.bf16.mxu0 %vm2116_vm1, %v2115_v6 }
  0x84   :  { %1907 = vmatprep.subr.bf16.mxu1 %v2115_v6  ;;  %1928 = vmatpush3.bf16.msra.mxu0 %v2084_v1 }
  0x85   :  { %1929 = vmatprep.subr.bf16.mxu0 %v2115_v6 }
  0x87   :  { %1908 = vmatpush3.bf16.msra.mxu1 %v2078_v9 }
  0x88   :  { %1909 = vmatprep.subr.bf16.mxu1 %v2115_v6  ;;  %1930 = vmatpush3.bf16.msra.mxu0 %v2085_v2 }
  0x89   :  { %1931 = vmatprep.subr.bf16.mxu0 %v2115_v6 }
  0x8b   :  { %1910 = vmatpush3.bf16.msra.mxu1 %v2079_v10 }
  0x8c   :  { %1911 = vmatprep.subr.bf16.mxu1 %v2115_v6  ;;  %1932 = vmatpush3.bf16.msra.mxu0 %v2086_v3 }
  0x8d   :  { %1933 = vmatprep.subr.bf16.mxu0 %v2115_v6 }
  0x8f   :  { %1912 = vmatpush3.bf16.msra.mxu1 %v2080_v11 }
  0x90   :  { %1913 = vmatprep.subr.bf16.mxu1 %v2115_v6  ;;  %1934 = vmatpush3.bf16.msra.mxu0 %v2087_v4 }
  0x91   :  { %1935 = vmatprep.subr.bf16.mxu0 %v2115_v6 }
  0x93   :  { %1914 = vmatpush3.bf16.msra.mxu1 %v1340_v13 }
  0x94   :  { %1919 = vmatprep.subr.bf16.mxu1 %v2115_v6  ;;  %1936 = vmatpush3.bf16.msra.mxu0 %v2088_v5 }
  0x95   :  { %1937 = vmatprep.subr.bf16.mxu0 %v2115_v6 }
  0xf5   :  { %v1744_v14 = vpop.f32.mrb[0].mxu0 }
  0xf6   :  { %v1745_v16 = vpop.f32.mrb[1].mxu0 }
  0xf7   :  { %v1746_v17 = vadd.f32 %v1745_v16, %v1744_v14  ;;  %v1747_v18 = vpop.f32.mrb[2].mxu0  ;;  %v1766_v19 = vpop.f32.mrb[0].mxu1  ;;  %v2090_v16 = vld [vmem:[%s2631_s7 + $0x30] ss:$0 sps:$4 sm:$0x33]  }
  0xf8   :  { %v1748_v20 = vpop.f32.mrb[3].mxu0  ;;  %v1767_v21 = vpop.f32.mrb[1].mxu1  ;;  %v1715_v18 = vld [vmem:[%s2630_s6] ss:$0 sm:$0xff] }
  0xf9   :  { %v1028_v22 = vadd.f32 %v1746_v17, %v1579_v15  ;;  %v1768_v23 = vadd.f32 %v1767_v21, %v1766_v19  ;;  %v1769_v24 = vpop.f32.mrb[2].mxu1  ;;  %v2089_v15 = vld [vmem:[%s2631_s7 + $0x28] sm:$0xff]   ;;  %v1522_v17 = vsel %vm1338_vm0, %v2090_v16, 0  ;;  %s2118_s7 = smov [#allocation2]  }
  0xfa   :  { %v1770_v25 = vpop.f32.mrb[3].mxu1  ;;  %1938 = vmatpush3.bf16.msra.mxu0 %v2089_v15  ;;  %s1571_s27 = sshll.u32 %s2118_s7, 4  ;;  %s1572_s27 = int_to_ptr.vmem [resolvable:$true] %s1571_s27 }
  0xfb   :  { %v1068_v26 = vadd.f32 %v1768_v23, %v1028_v22  ;;  %1939 = vmatprep.subr.bf16.mxu0 %v2115_v6  ;;  %s2091_s6 = scalar_lea.vmem %s1572_s27, 128  ;;  %p2096_p1 = scmp.lt.s32.totalorder %s1572_s27, %s1572_s27 }
  0xfc   :  { %p2092_p0 = scmp.ne.s32.totalorder %s1572_s27, %s2091_s6  ;;  %p2097_p2 = scmp.lt.s32.totalorder %s2091_s6, %s2091_s6 }
  0xfe   :  { %1940 = vmatpush3.bf16.msra.mxu0 %v1522_v17  ;;  %p2098_p3 = por %p2097_p2, %p2096_p1 }
 0x100   :  { %p2099_p4 = pnand %p2098_p3, %p2092_p0 }
 0x115   :  { %v1788_v27 = vpop.f32.mrb[4].mxu0 }
 0x116   :  { %v1789_v28 = vpop.f32.mrb[5].mxu0 }
 0x117   :  { %v1790_v29 = vadd.f32 %v1789_v28, %v1788_v27  ;;  %v1791_v30 = vpop.f32.mrb[6].mxu0  ;;  %v1810_v31 = vpop.f32.mrb[4].mxu1 }
 0x118   :  { %v1792_v32 = vpop.f32.mrb[7].mxu0  ;;  %v1811_v34 = vpop.f32.mrb[5].mxu1 }
 0x119   :  { %v1108_v33 = vadd.f32 %v1790_v29, %v1068_v26  ;;  %v1812_v35 = vadd.f32 %v1811_v34, %v1810_v31  ;;  %v1813_v36 = vpop.f32.mrb[6].mxu1 }
 0x11a   :  { %v1814_v37 = vpop.f32.mrb[7].mxu1 }
 0x11b   :  { %v1148_v38 = vadd.f32 %v1812_v35, %v1108_v33 }
 0x135   :  { %v1832_v39 = vpop.f32.mrb[8].mxu0 }
 0x136   :  { %v1833_v40 = vpop.f32.mrb[9].mxu0 }
 0x137   :  { %v1834_v41 = vadd.f32 %v1833_v40, %v1832_v39  ;;  %v1835_v42 = vpop.f32.mrb[10].mxu0  ;;  %v1854_v43 = vpop.f32.mrb[8].mxu1 }
 0x138   :  { %v1836_v44 = vpop.f32.mrb[11].mxu0  ;;  %v1855_v45 = vpop.f32.mrb[9].mxu1 }
 0x139   :  { %v1188_v46 = vadd.f32 %v1834_v41, %v1148_v38  ;;  %v1856_v47 = vadd.f32 %v1855_v45, %v1854_v43  ;;  %v1857_v48 = vpop.f32.mrb[10].mxu1 }
 0x13a   :  { %v1858_v49 = vpop.f32.mrb[11].mxu1 }
 0x13b   :  { %v1228_v50 = vadd.f32 %v1856_v47, %v1188_v46 }
 0x155   :  { %v1876_v51 = vpop.f32.mrb[12].mxu0 }
 0x156   :  { %v1877_v52 = vpop.f32.mrb[13].mxu0 }
 0x157   :  { %v1878_v53 = vadd.f32 %v1877_v52, %v1876_v51  ;;  %v1879_v54 = vpop.f32.mrb[14].mxu0 }
 0x158   :  { %v1880_v55 = vpop.f32.mrb[15].mxu0 }
 0x159   :  { %v1268_v56 = vadd.f32 %v1878_v53, %v1228_v50 }
 0x15b   :  { %v1273_v57 = vmax.f32 %v1268_v56, 0.0 }
 0x15d   :  { %v1274_v59 = vpack.c.bf16 %v1273_v57, %v1273_v57 }
 0x15f   :  { %1916 = vmatmul.mubr.msk.bf16.vlgmr.msra.gmra.mrb[12].mxu1 %vm1334_vm2, %v1274_v59 }
 0x160   :  { %1920 = vmatpush3.bf16.msra.mxu1 %v2082_v58  ;;  %1923 = vmatprep.mubr.msk.bf16.mxu1 %vm2116_vm1, %v2115_v6 }
 0x161   :  { %1921 = vmatprep.subr.bf16.mxu1 %v2115_v6  ;;  %v1719_v6 = vld [vmem:[%s2632_s8] ss:$0 sm:$0xff] }
 0x164   :  { %1922 = vmatpush3.bf16.msra.mxu1 %v1415_v0 }
 0x232   :  { %v1376_v8 = vpop.f32.mrb[12].mxu1 }
 0x233   :  { %v1377_v9 = vadd.f32 %v1706_v7, %v1376_v8  ;;  %v1917_v10 = vpop.f32.mrb[13].mxu1 }
 0x234   :  { %v1379_v11 = vpop.f32.mrb[14].mxu1 }
 0x235   :  { %v1382_v12 = vmax.f32 %v1377_v9, 0.0  ;;  %v1918_v13 = vpop.f32.mrb[15].mxu1 }
 0x237   :  { %v1383_v14 = vpack.c.bf16 %v1382_v12, %v1382_v12 }
 0x239   :  { %1924 = vmatmul.mubr.msk.bf16.vlgmr.msra.gmra.mrb[16].mxu1 %vm1406_vm5, %v1383_v14 }
 0x30c   :  { %v1451_v19 = vpop.f32.mrb[16].mxu1 }
 0x30d   :  { %v1452_v20 = vadd.f32 %v1715_v18, %v1451_v19  ;;  %v1925_v21 = vpop.f32.mrb[17].mxu1 }
 0x30e   :  { %v1454_v22 = vpop.f32.mrb[18].mxu1 }
 0x30f   :  { %v1457_v23 = vmax.f32 %v1452_v20, 0.0  ;;  %v1926_v24 = vpop.f32.mrb[19].mxu1 }
 0x311   :  { %v1458_v25 = vpack.c.bf16 %v1457_v23, %v1457_v23 }
 0x313   :  { %1942 = vmatmul.mubr.msk.bf16.vlgmr.msra.gmra.mrb[16].mxu0 %vm1334_vm2, %v1458_v25 }
 0x3e6   :  { %v1558_v26 = vpop.f32.mrb[16].mxu0 }
 0x3e7   :  { %v1559_v27 = vadd.f32 %v1719_v6, %v1558_v26  ;;  %v1943_v28 = vpop.f32.mrb[17].mxu0 }
 0x3e8   :  { %v1561_v29 = vpop.f32.mrb[18].mxu0 }
 0x3e9   :  { %1564 = vst [vmem:[#allocation2] sm:$0xff] %v1559_v27  ;;  %v1944_v30 = vpop.f32.mrb[19].mxu0 }
 0x3ea   :  { %2102 = shalt.err (!%p2099_p4)
}
 0x3eb   :  { %s2103_s8 = scalar_lea.hbm %s2633_s9, 128 }
 0x3ec   :  { %p2104_p5 = scmp.ne.s32.totalorder %s2633_s9, %s2103_s8  ;;  %p2107_p6 = scmp.lt.u32.totalorder %s2103_s8, %s2633_s9 }
 0x3ee   :  { %p2109_p7 = pnand %p2107_p6, %p2104_p5 }
 0x3f0   :  { %2112 = shalt.err (!%p2109_p7)
}
 0x3f1   :  { %1574 = dma.vmem_to_hbm [thread:$0]  %s1572_s27, 128, %s2633_s9, [#allocation3]  }
 0x3f2   :  { %2113 = dma.done.wait [#allocation3], 128  }
 0x3f3   :  { %2114 = vsyncadd [#allocation3], 4294967168 }
 0x3f4   :  { %1578 = vsyncpa [#allocation3], 1 }

</bundles_post_ra>
